<compile_context>
chip_gen: v7x
topology: tpu7x:2x2x1
jax: 0.10.0
libtpu: 0.0.40
codegen_flags: <defaults>
</compile_context>

<pallas_src>
import functools

import jax
import jax.numpy as jnp
from jax import lax
from jax.experimental import pallas as pl
from jax.experimental.pallas import tpu as pltpu


def _attention_kernel(hproj_ref, enc_ref, we_ref, v_ref, out_ref, *, hc, s_valid):
    # hproj_ref: (TB, Hp)      f32 (bias folded in)
    # enc_ref  : (TB, Sp, Hp)  compute dtype (bf16 or f32)
    # we_ref   : (Hp, Hp)      compute dtype (pre-transposed: x @ We.T == x @ we_ref)
    # v_ref    : (1, Hp)       f32
    # out_ref  : (TB, Sp)      f32
    tb, s_pad, h_pad = enc_ref.shape

    # Sp is a multiple of the sublane tile for enc's dtype, so this merge of the
    # leading dims is a layout-preserving view (no relayout copy).
    enc2d = enc_ref[...].reshape(tb * s_pad, h_pad)
    hp3 = hproj_ref[...].astype(jnp.float32).reshape(tb, 1, h_pad)
    v3 = v_ref[...].astype(jnp.float32).reshape(1, 1, h_pad)

    # Chunk the e-projection over the output-H (N) dimension: the f32
    # intermediates are (tb, Sp, hc) instead of (tb, Sp, Hp); `scores` carries a
    # serial dependence so chunk buffers are reused.
    scores = jnp.zeros((tb, s_pad), jnp.float32)
    for c in range(h_pad // hc):
        lo = c * hc                                   # static, 128-aligned
        eproj = jnp.dot(enc2d, we_ref[:, lo:lo + hc],
                        preferred_element_type=jnp.float32)   # MXU, f32 acc
        eproj = eproj.reshape(tb, s_pad, hc)
        energy = jnp.tanh(eproj + hp3[:, :, lo:lo + hc])      # f32 on EUP/VPU
        # N=1 v-projection: elementwise multiply + lane reduce (VPU/XLU slots).
        scores = scores + jnp.sum(energy * v3[:, :, lo:lo + hc], axis=-1)

    # Mask padded S columns so the softmax matches the unpadded distribution.
    if s_pad != s_valid:
        col = lax.broadcasted_iota(jnp.int32, (tb, s_pad), 1)
        scores = jnp.where(col < s_valid, scores, -jnp.inf)

    # Numerically stable softmax over S (the lane axis) -> lane-dense store.
    m = jnp.max(scores, axis=-1, keepdims=True)
    e = jnp.exp(scores - m)
    out_ref[...] = (e / jnp.sum(e, axis=-1, keepdims=True)).astype(out_ref.dtype)


def _round_up(x, m):
    return ((x + m - 1) // m) * m


def _physical_vmem_bytes():
    try:
        return int(pltpu.get_tpu_info().vmem_capacity_bytes)
    except Exception:
        return 64 << 20          # conservative fallback (v7x per-TensorCore VMEM)


def attention_forward(hidden, encoder_outputs, attn_w, attn_b, v_w, *,
                      compute_dtype=jnp.bfloat16, block_b=None):
    """hidden: (B,H); encoder_outputs: (B,S,H).
    attn_w: (H, 2H), attn_b: (H,), v_w: (1, H)   (PyTorch nn.Linear conventions).
    compute_dtype: dtype of the MXU operands (enc / We); accumulation and all
    elementwise math are f32.  Returns the (B, S) softmax attention in f32."""
    B, H = hidden.shape
    _, S, _ = encoder_outputs.shape
    esize = jnp.dtype(compute_dtype).itemsize

    # ---- TPU-friendly padding ------------------------------------------------
    H_pad = _round_up(H, 128)                  # lane dim of matmul / tanh / reduce
    sub = max(8, 32 // esize)                  # sublane tile: 8 (f32) / 16 (bf16)
    S_pad = _round_up(S, sub)

    # Split the concat-weight and pre-transpose so the kernel does plain x @ W.
    wh_t = jnp.transpose(attn_w[:, :H])        # (H, H)
    we_t = jnp.transpose(attn_w[:, H:])        # (H, H)

    # Hoisted hidden projection (bias folded in): one (B,H)x(H,H) XLA GEMM.
    hproj = hidden.astype(jnp.float32) @ wh_t + attn_b[None, :]        # (B, H) f32

    # ---- VMEM-budget-aware batch-tile selection --------------------------------
    hc = 512 if H_pad % 512 == 0 else (256 if H_pad % 256 == 0 else 128)
    physical = _physical_vmem_bytes()
    vmem_cap = (physical * 72) // 100          # ~92 MiB on 128 MiB parts, ~46 MiB on v7x
    fixed = H_pad * H_pad * esize + H_pad * 4           # We (single-buffered) + v row
    per_row = (2 * S_pad * H_pad * esize                # enc tile, double-buffered
               + 2 * H_pad * 4                          # hproj, double-buffered
               + 2 * S_pad * 4                          # out, double-buffered
               + 2 * S_pad * hc * 4                     # eproj/energy chunk (f32)
               + 4 * S_pad * 4)                         # scores / softmax temps
    budget = vmem_cap - fixed - (4 << 20)               # compiler-scratch headroom
    tb_cap = max(1, budget // per_row)

    if block_b is not None:
        tb = int(block_b)
    elif tb_cap >= B:
        # Whole batch fits in one tile; still split into 2 steps when there is
        # enough work so v7x's two TensorCores both get a share.
        tb = _round_up(-(-B // 2), 8) if B >= 16 else B
    else:
        tb = max(8, (tb_cap // 8) * 8)         # biggest multiple-of-8 tile that fits
    tb = min(tb, _round_up(B, 8))
    steps = -(-B // tb)
    if steps > 2 and steps % 2:                # balance the 2-TC megacore
        tb = max(8, _round_up(-(-B // (steps + 1)), 8))
        steps = -(-B // tb)
    # BlockSpec legality: tb is the second-minor dim of hproj/out blocks.
    assert tb % 8 == 0 or steps == 1, (tb, steps)
    B_pad = steps * tb

    # ---- pad operands (zeros; padded j columns contribute 0, padded S columns
    #      are masked inside the kernel, padded B rows are sliced off) ----------
    enc = jnp.pad(encoder_outputs,
                  ((0, B_pad - B), (0, S_pad - S), (0, H_pad - H))
                  ).astype(compute_dtype)
    we = jnp.pad(we_t, ((0, H_pad - H), (0, H_pad - H))).astype(compute_dtype)
    v_row = jnp.pad(v_w.astype(jnp.float32), ((0, 0), (0, H_pad - H)))
    hproj = jnp.pad(hproj, ((0, B_pad - B), (0, H_pad - H)))

    need = fixed + tb * per_row + (8 << 20)
    vmem_limit = int(min(max(need, 32 << 20), (physical * 3) // 4))

    kernel = functools.partial(_attention_kernel, hc=hc, s_valid=S)
    out = pl.pallas_call(
        kernel,
        out_shape=jax.ShapeDtypeStruct((B_pad, S_pad), jnp.float32),
        grid_spec=pltpu.PrefetchScalarGridSpec(
            num_scalar_prefetch=0,
            grid=(steps,),
            in_specs=[
                pl.BlockSpec((tb, H_pad), lambda b: (b, 0)),            # hproj (f32)
                pl.BlockSpec((tb, S_pad, H_pad), lambda b: (b, 0, 0)),  # encoder tile
                pl.BlockSpec((H_pad, H_pad), lambda b: (0, 0),
                             pipeline_mode=pl.Buffered(1)),             # We^T, resident
                pl.BlockSpec((1, H_pad), lambda b: (0, 0),
                             pipeline_mode=pl.Buffered(1)),             # v row, resident
            ],
            out_specs=pl.BlockSpec((tb, S_pad), lambda b: (b, 0)),
        ),
        compiler_params=pltpu.CompilerParams(
            dimension_semantics=("parallel",),
            vmem_limit_bytes=vmem_limit,
        ),
    )(hproj, enc, we, v_row)
    return out[:B, :S]


def attention_ref(hidden, encoder_outputs, attn_w, attn_b, v_w):
    """Pure-JAX reference mirroring the PyTorch forward."""
    B, S, H = encoder_outputs.shape
    h_rep = jnp.broadcast_to(hidden[:, None, :], (B, S, H))
    cat = jnp.concatenate([h_rep, encoder_outputs], axis=2)          # (B, S, 2H)
    energy = jnp.tanh(jnp.einsum("bsk,hk->bsh", cat, attn_w) + attn_b)
    attention = jnp.einsum("bsh,oh->bso", energy, v_w)[..., 0]       # (B, S)
    return jax.nn.softmax(attention, axis=1)


if __name__ == "__main__":
    B, S, H = 2, 8, 32

    key = jax.random.PRNGKey(0)
    k1, k2, k3, k4, k5 = jax.random.split(key, 5)

    hidden = jax.random.normal(k1, (B, H), dtype=jnp.float32)
    encoder_outputs = jax.random.normal(k2, (B, S, H), dtype=jnp.float32)

    # Shapes follow nn.Linear(H+H, H) and nn.Linear(H, 1, bias=False).
    attn_w = 0.1 * jax.random.normal(k3, (H, 2 * H), dtype=jnp.float32)
    attn_b = 0.1 * jax.random.normal(k4, (H,), dtype=jnp.float32)
    v_w = 0.1 * jax.random.normal(k5, (1, H), dtype=jnp.float32)

    ref = attention_ref(hidden, encoder_outputs, attn_w, attn_b, v_w)

    # Default path: bf16 MXU operands (bandwidth-optimal), f32 accumulation.
    out = attention_forward(hidden, encoder_outputs, attn_w, attn_b, v_w)
    out = jax.block_until_ready(out)
    assert out.shape == (B, S)
    assert jnp.allclose(out, ref, atol=2e-2, rtol=2e-2), (out, ref)
    assert jnp.allclose(jnp.sum(out, axis=1), 1.0, atol=1e-3)

    # f32 MXU operands — tight check against the PyTorch-equivalent reference.
    out_f32 = attention_forward(hidden, encoder_outputs, attn_w, attn_b, v_w,
                                compute_dtype=jnp.float32)
    out_f32 = jax.block_until_ready(out_f32)
    assert jnp.allclose(out_f32, ref, atol=1e-5, rtol=1e-5), (out_f32, ref)
    assert jnp.allclose(jnp.sum(out_f32, axis=1), 1.0, atol=1e-5)

    print("KERNEL_OK")
</pallas_src>

<mosaic_0001>
module attributes {stable_mosaic.version = 11 : i64} {
  func.func @_attention_kernel(%arg0: i32, %arg1: memref<2x128xf32, #tpu.memory_space<vmem>>, %arg2: memref<2x16x128xbf16, #tpu.memory_space<vmem>>, %arg3: memref<128x128xbf16, #tpu.memory_space<vmem>>, %arg4: memref<1x128xf32, #tpu.memory_space<vmem>>, %arg5: memref<2x16xf32, #tpu.memory_space<vmem>>) attributes {dimension_semantics = [#tpu.dimension_semantics<parallel>], iteration_bounds = array<i64: 1>, scalar_prefetch = 0 : i64, scratch_operands = 0 : i64, tpu.core_type = #tpu.core_type<tc>, window_params = [{transform_indices = @transform_0, window_bounds = array<i64: 2, 128>}, {transform_indices = @transform_1, window_bounds = array<i64: 2, 16, 128>}, {pipeline_mode = #tpu.pipeline_mode<synchronous>, transform_indices = @transform_2, window_bounds = array<i64: 128, 128>}, {pipeline_mode = #tpu.pipeline_mode<synchronous>, transform_indices = @transform_3, window_bounds = array<i64: 1, 128>}, {transform_indices = @transform_4, window_bounds = array<i64: 2, 16>}]} {
    %c0 = arith.constant 0 : index
    %c0_0 = arith.constant 0 : index
    %c0_1 = arith.constant 0 : index
    %0 = vector.load %arg2[%c0, %c0_0, %c0_1] : memref<2x16x128xbf16, #tpu.memory_space<vmem>>, vector<2x16x128xbf16>
    %1 = vector.shape_cast %0 : vector<2x16x128xbf16> to vector<32x128xbf16>
    %c0_2 = arith.constant 0 : index
    %c0_3 = arith.constant 0 : index
    %2 = vector.load %arg1[%c0_2, %c0_3] : memref<2x128xf32, #tpu.memory_space<vmem>>, vector<2x128xf32>
    %3 = vector.shape_cast %2 : vector<2x128xf32> to vector<2x1x128xf32>
    %c0_4 = arith.constant 0 : index
    %c0_5 = arith.constant 0 : index
    %4 = vector.load %arg4[%c0_4, %c0_5] : memref<1x128xf32, #tpu.memory_space<vmem>>, vector<1x128xf32>
    %5 = vector.shape_cast %4 : vector<1x128xf32> to vector<1x1x128xf32>
    %cst = arith.constant 0.000000e+00 : f32
    %6 = vector.broadcast %cst : f32 to vector<2x16xf32>
    %c0_6 = arith.constant 0 : index
    %c0_7 = arith.constant 0 : index
    %7 = vector.load %arg3[%c0_6, %c0_7] : memref<128x128xbf16, #tpu.memory_space<vmem>>, vector<128x128xbf16>
    %cst_8 = arith.constant dense<0.000000e+00> : vector<32x128xf32>
    %8 = tpu.matmul %1, %7, %cst_8 {dimension_numbers = #tpu.dot_dimension_numbers<[1], [0], [0], [1], [0, 0, 1, 1], [], []>} : vector<32x128xbf16>, vector<128x128xbf16>, vector<32x128xf32> -> vector<32x128xf32>
    %9 = vector.shape_cast %8 : vector<32x128xf32> to vector<2x16x128xf32>
    %10 = vector.broadcast %3 : vector<2x1x128xf32> to vector<2x16x128xf32>
    %11 = arith.addf %9, %10 : vector<2x16x128xf32>
    %12 = math.tanh %11 : vector<2x16x128xf32>
    %13 = vector.broadcast %5 : vector<1x1x128xf32> to vector<2x16x128xf32>
    %14 = arith.mulf %12, %13 : vector<2x16x128xf32>
    %cst_9 = arith.constant dense<0.000000e+00> : vector<2x16xf32>
    %15 = vector.multi_reduction <add>, %14, %cst_9 [2] : vector<2x16x128xf32> to vector<2x16xf32>
    %16 = arith.addf %6, %15 : vector<2x16xf32>
    %17 = tpu.iota {dimensions = array<i32: 1>} : vector<2x16xi32>
    %c8_i32 = arith.constant 8 : i32
    %18 = vector.broadcast %c8_i32 : i32 to vector<2x16xi32>
    %19 = arith.cmpi slt, %17, %18 : vector<2x16xi32>
    %cst_10 = arith.constant 0xFF800000 : f32
    %20 = vector.broadcast %cst_10 : f32 to vector<2x16xf32>
    %21 = arith.select %19, %16, %20 : vector<2x16xi1>, vector<2x16xf32>
    %cst_11 = arith.constant dense<0xFF800000> : vector<2xf32>
    %22 = vector.multi_reduction <maximumf>, %21, %cst_11 [1] : vector<2x16xf32> to vector<2xf32>
    %23 = vector.shape_cast %22 : vector<2xf32> to vector<2x1xf32>
    %24 = vector.broadcast %23 : vector<2x1xf32> to vector<2x16xf32>
    %25 = arith.subf %21, %24 : vector<2x16xf32>
    %26 = math.exp %25 : vector<2x16xf32>
    %cst_12 = arith.constant dense<0.000000e+00> : vector<2xf32>
    %27 = vector.multi_reduction <add>, %26, %cst_12 [1] : vector<2x16xf32> to vector<2xf32>
    %28 = vector.shape_cast %27 : vector<2xf32> to vector<2x1xf32>
    %29 = vector.broadcast %28 : vector<2x1xf32> to vector<2x16xf32>
    %30 = arith.divf %26, %29 : vector<2x16xf32>
    %c0_13 = arith.constant 0 : index
    %c0_14 = arith.constant 0 : index
    %31 = vector.load %arg5[%c0_13, %c0_14] : memref<2x16xf32, #tpu.memory_space<vmem>>, vector<2x16xf32>
    tpu.vector_store %arg5[%c0_13, %c0_14], %30 {strides = array<i32>} : memref<2x16xf32, #tpu.memory_space<vmem>>, vector<2x16xf32>,
    return
  }
  func.func @transform_0(%arg0: i32) -> (i32, i32) {
    %c0_i32 = arith.constant 0 : i32
    %c0_i32_0 = arith.constant 0 : i32
    return %arg0, %c0_i32 : i32, i32
  }
  func.func @transform_1(%arg0: i32) -> (i32, i32, i32) {
    %c0_i32 = arith.constant 0 : i32
    %c0_i32_0 = arith.constant 0 : i32
    %c0_i32_1 = arith.constant 0 : i32
    return %arg0, %c0_i32, %c0_i32_0 : i32, i32, i32
  }
  func.func @transform_2(%arg0: i32) -> (i32, i32) {
    %c0_i32 = arith.constant 0 : i32
    %c0_i32_0 = arith.constant 0 : i32
    %c0_i32_1 = arith.constant 0 : i32
    return %c0_i32, %c0_i32_0 : i32, i32
  }
  func.func @transform_3(%arg0: i32) -> (i32, i32) {
    %c0_i32 = arith.constant 0 : i32
    %c0_i32_0 = arith.constant 0 : i32
    %c0_i32_1 = arith.constant 0 : i32
    return %c0_i32, %c0_i32_0 : i32, i32
  }
  func.func @transform_4(%arg0: i32) -> (i32, i32) {
    %c0_i32 = arith.constant 0 : i32
    %c0_i32_0 = arith.constant 0 : i32
    return %arg0, %c0_i32 : i32, i32
  }
}

</mosaic_0001>

<bundles_post_ra>
// kernel: tpu_custom_call.1
= control target key start
LH: loop header
LB: loop body
LE: loop exit
PB: predicated region body
PF: predicated region fallthrough
CT: control target
= control target key end

     0   :  { %9 = vsyncpa [#allocation3], 0  ;;  %s569_s0 = inlined_call_operand.hbm [shape: f32[2,128], index: 0, kind: input, shape index: {}]   ;;  %s570_s1 = inlined_call_operand.hbm [shape: bf16[2,16,128], index: 1, kind: input, shape index: {}]   ;;  %s571_s2 = inlined_call_operand.hbm [shape: bf16[128,128], index: 2, kind: input, shape index: {}]   ;;  %s572_s3 = inlined_call_operand.vmem [shape: f32[1,128], index: 3, kind: input, shape index: {}]   ;;  %s573_s4 = inlined_call_operand.hbm [shape: f32[2,16], index: 4, kind: output, shape index: {}]  }
   0x1   :  { %10 = vsyncpa [#allocation6], 0 }
   0x2   :  { %11 = vsyncpa [#allocation4], 0  ;;  %s477_s15 = smov [#allocation5]   ;;  %s383_s19 = scalar_lea.hbm %s570_s1, 256 }
   0x3   :  { %s27_s16 = sshll.u32 %s477_s15, 4  ;;  %p384_p0 = scmp.ne.s32.totalorder %s570_s1, %s383_s19  ;;  %s28_s16 = int_to_ptr.vmem [resolvable:$true] %s27_s16 }
   0x4   :  { %p387_p1 = scmp.lt.u32.totalorder %s383_s19, %s570_s1 }
   0x6   :  { %p389_p2 = pnand %p387_p1, %p384_p0 }
   0x8   :  { %392 = shalt.err (!%p389_p2)
}
   0x9   :  { %s393_s24 = scalar_lea.vmem %s28_s16, 256  ;;  %p398_p4 = scmp.lt.s32.totalorder %s28_s16, %s28_s16 }
   0xa   :  { %p394_p3 = scmp.ne.s32.totalorder %s28_s16, %s393_s24  ;;  %p399_p5 = scmp.lt.s32.totalorder %s393_s24, %s393_s24 }
   0xc   :  { %p400_p6 = por %p399_p5, %p398_p4 }
   0xe   :  { %p401_p7 = pnand %p400_p6, %p394_p3 }
  0x10   :  { %404 = shalt.err (!%p401_p7)
}
  0x11   :  { %s478_s25 = smov 64   ;;  %s479_s26 = smov 4  }
  0x12   :  { %33 = dma.hbm_to_vmem [thread:$0]  %s570_s1, 256, %s28_s16, [#allocation6], %s478_s25, %s478_s25, %s479_s26  }
  0x13   :  { %s480_s29 = smov [#allocation2]   ;;  %s481_s5 = smov [#allocation7]  }
  0x14   :  { %s18_s30 = sshll.u32 %s480_s29, 4  ;;  %s39_s6 = sshll.u32 %s481_s5, 4  ;;  %s19_s30 = int_to_ptr.vmem [resolvable:$true] %s18_s30  ;;  %s40_s6 = int_to_ptr.vmem [resolvable:$true] %s39_s6 }
  0x15   :  { %s405_s9 = scalar_lea.hbm %s569_s0, 32 }
  0x16   :  { %p406_p8 = scmp.ne.s32.totalorder %s569_s0, %s405_s9  ;;  %p409_p9 = scmp.lt.u32.totalorder %s405_s9, %s569_s0 }
  0x18   :  { %p411_p10 = pnand %p409_p9, %p406_p8 }
  0x1a   :  { %414 = shalt.err (!%p411_p10)
}
  0x1b   :  { %s415_s1 = scalar_lea.vmem %s19_s30, 32  ;;  %p420_p12 = scmp.lt.s32.totalorder %s19_s30, %s19_s30 }
  0x1c   :  { %p416_p11 = scmp.ne.s32.totalorder %s19_s30, %s415_s1  ;;  %p421_p13 = scmp.lt.s32.totalorder %s415_s1, %s415_s1 }
  0x1e   :  { %p422_p0 = por %p421_p13, %p420_p12 }
  0x20   :  { %p423_p1 = pnand %p422_p0, %p416_p11 }
  0x22   :  { %426 = shalt.err (!%p423_p1)
}
  0x23   :  { %21 = dma.hbm_to_vmem [thread:$0]  %s569_s0, 32, %s19_s30, [#allocation3]  }
  0x24   :  { %s427_s18 = scalar_lea.hbm %s571_s2, 1024 }
  0x25   :  { %p428_p2 = scmp.ne.s32.totalorder %s571_s2, %s427_s18  ;;  %p431_p3 = scmp.lt.u32.totalorder %s427_s18, %s571_s2 }
  0x27   :  { %p433_p4 = pnand %p431_p3, %p428_p2 }
  0x29   :  { %436 = shalt.err (!%p433_p4)
}
  0x2a   :  { %s437_s23 = scalar_lea.vmem %s40_s6, 1024  ;;  %p442_p6 = scmp.lt.s32.totalorder %s40_s6, %s40_s6 }
  0x2b   :  { %p438_p5 = scmp.ne.s32.totalorder %s40_s6, %s437_s23  ;;  %p443_p7 = scmp.lt.s32.totalorder %s437_s23, %s437_s23 }
  0x2d   :  { %p444_p8 = por %p443_p7, %p442_p6 }
  0x2f   :  { %p445_p9 = pnand %p444_p8, %p438_p5 }
  0x31   :  { %448 = shalt.err (!%p445_p9)
}
  0x32   :  { %45 = dma.hbm_to_vmem [thread:$0]  %s571_s2, 1024, %s40_s6, [#allocation6], %s478_s25, %s478_s25, %s479_s26  }
  0x33   :  { %471 = dma.done.wait [#allocation3], 32  }
  0x34   :  { %472 = vsyncadd [#allocation3], 4294967264 }
  0x35   :  { %473 = dma.done.wait [#allocation6], 1280  }
  0x36   :  { %474 = vsyncadd [#allocation6], 4294966016  ;;  %v361_v0 = vld [vmem:[#allocation7] sm:$0xff]   ;;  %v362_v1 = vld [vmem:[#allocation7 + $0x8] sm:$0xff]   ;;  %v482_v10 = vmov 1966171168   ;;  %v75_v12 = vlaneseq }
  0x37   :  { %334 = vmatprep.subr.bf16.mxu0 %v361_v0  ;;  %v363_v2 = vld [vmem:[#allocation7 + $0x10] sm:$0xff]   ;;  %v364_v3 = vld [vmem:[#allocation7 + $0x18] sm:$0xff]   ;;  %v365_v5 = vld [vmem:[#allocation7 + $0x20] sm:$0xff]   ;;  %v73_v11 = vunpack.c.l.s4 %v482_v10  ;;  %vm268_vm0 = vcmask 130112   ;;  %vm279_vm1 = vcmask 1041409   ;;  %vm283_vm3 = vcmask 123904  }
  0x38   :  { %335 = vmatpush3.bf16.msra.mxu0 %v361_v0  ;;  %v369_v4 = vld [vmem:[#allocation5] sm:$0xff]   ;;  %v366_v6 = vld [vmem:[#allocation7 + $0x28] sm:$0xff]   ;;  %v368_v8 = vld [vmem:[#allocation7 + $0x38] sm:$0xff]   ;;  %v76_v14 = vshrl.u32 %v75_v12, 7  ;;  %v253_v40 = vand.u32 127, %v75_v12 }
  0x39   :  { %336 = vmatprep.subr.bf16.mxu0 %v362_v1  ;;  %350 = vmatprep.mubr.bf16.mxu0 %v369_v4  ;;  %v367_v7 = vld [vmem:[#allocation7 + $0x30] sm:$0xff]   ;;  %v370_v9 = vld [vmem:[#allocation5 + $0x8] sm:$0xff]   ;;  %v74_v13 = vunpack.c.0.s8 %v73_v11  ;;  %v312_v15 = vld.sshfl [vmem:[#allocation2] sm:$0x11 pattern:$0x75316420] }
  0x3a   :  { %v71_v16 = vcombine.high %v312_v15, %v312_v15  ;;  %v214_v19 = vsub.s32 0, %v76_v14  ;;  %v323_v31 = vld [vmem:[%s572_s3] ss:$0 sm:$0xff]  ;;  %v263_v41 = vadd.s32 4294967288, %v253_v40  ;;  %v261_v43 = vsub.s32 %v253_v40, %v76_v14  ;;  %s483_s3 = smov [#allocation8]  }
  0x3b   :  { %v77_v17 = vsub.s32 %v74_v13, %v76_v14  ;;  %vm254_vm2 = vcmp.lt.s32.totalorder %v253_v40, 8  ;;  %s302_s26 = sshll.u32 %s483_s3, 4  ;;  %s303_s26 = int_to_ptr.vmem [resolvable:$true] %s302_s26 }
  0x3c   :  { %337 = vmatpush3.bf16.msra.mxu0 %v362_v1  ;;  %v266_v45 = vsub.s32 %v263_v41, %v76_v14  ;;  %s449_s27 = scalar_lea.vmem %s303_s26, 32  ;;  %p454_p11 = scmp.lt.s32.totalorder %s303_s26, %s303_s26 }
  0x3d   :  { %338 = vmatprep.subr.bf16.mxu0 %v363_v2  ;;  %v85_v18 = vrot.slane %v71_v16, %v77_v17  ;;  %v78_v20 = vrot.slane %v312_v15, %v77_v17  ;;  %p450_p10 = scmp.ne.s32.totalorder %s303_s26, %s449_s27  ;;  %p455_p12 = scmp.lt.s32.totalorder %s449_s27, %s449_s27 }
  0x3f   :  { %v219_v21 = vrot.slane %v85_v18, %v214_v19  ;;  %v215_v22 = vrot.slane %v78_v20, %v214_v19  ;;  %p456_p13 = por %p455_p12, %p454_p11 }
  0x40   :  { %339 = vmatpush3.bf16.msra.mxu0 %v363_v2 }
  0x41   :  { %340 = vmatprep.subr.bf16.mxu0 %v364_v3  ;;  %p457_p0 = pnand %p456_p13, %p450_p10 }
  0x44   :  { %341 = vmatpush3.bf16.msra.mxu0 %v364_v3 }
  0x45   :  { %342 = vmatprep.subr.bf16.mxu0 %v365_v5 }
  0x48   :  { %343 = vmatpush3.bf16.msra.mxu0 %v365_v5 }
  0x49   :  { %344 = vmatprep.subr.bf16.mxu0 %v366_v6 }
  0x4c   :  { %345 = vmatpush3.bf16.msra.mxu0 %v366_v6 }
  0x4d   :  { %346 = vmatprep.subr.bf16.mxu0 %v367_v7 }
  0x50   :  { %347 = vmatpush3.bf16.msra.mxu0 %v367_v7 }
  0x51   :  { %348 = vmatprep.subr.bf16.mxu0 %v368_v8 }
  0x54   :  { %349 = vmatpush3.bf16.msra.mxu0 %v368_v8 }
  0x57   :  { %351 = vmatmul.mubr.bf16.vlgmr.msra.gmra.mrb[0].mxu0 %v370_v9 }
 0x12a   :  { %v352_v23 = vpop.f32.mrb[0].mxu0 }
 0x12b   :  { %v224_v24 = vadd.f32 %v352_v23, %v219_v21  ;;  %v197_v25 = vpop.f32.mrb[1].mxu0 }
 0x12c   :  { %v222_v26 = vadd.f32 %v215_v22, %v197_v25  ;;  %v353_v27 = vpop.f32.mrb[2].mxu0 }
 0x12d   :  { %371 = vtanh.f32 %v224_v24  ;;  %v225_v28 = vadd.f32 %v353_v27, %v219_v21  ;;  %v200_v29 = vpop.f32.mrb[3].mxu0 }
 0x12e   :  { %373 = vtanh.f32 %v222_v26  ;;  %v223_v30 = vadd.f32 %v215_v22, %v200_v29 }
 0x12f   :  { %375 = vtanh.f32 %v225_v28 }
 0x130   :  { %377 = vtanh.f32 %v223_v30 }
 0x137   :  { %v372_v32 = vpop.eup %371 }
 0x138   :  { %v374_v33 = vpop.eup %373  ;;  %v238_v34 = vmul.f32 %v372_v32, %v323_v31 }
 0x139   :  { %v376_v35 = vpop.eup %375  ;;  %v236_v36 = vmul.f32 %v374_v33, %v323_v31 }
 0x13a   :  { %v378_v37 = vpop.eup %377  ;;  %244 = vadd.xlane.f32.xlu1 %v238_v34  ;;  %v239_v38 = vmul.f32 %v376_v35, %v323_v31 }
 0x13b   :  { %240 = vadd.xlane.f32.xlu0 %v236_v36  ;;  %v237_v39 = vmul.f32 %v378_v37, %v323_v31 }
 0x13e   :  { %246 = vadd.xlane.f32.xlu1 %v239_v38 }
 0x13f   :  { %242 = vadd.xlane.f32.xlu0 %v237_v39 }
 0x1c7   :  { %v245_v42 = vpop.xlane.xlu1 %244 }
 0x1c8   :  { %v241_v44 = vpop.xlane.xlu0 %240  ;;  %v273_v47 = vrot.slane %v245_v42, %v261_v43 }
 0x1c9   :  { %v262_v50 = vrot.slane %v241_v44, %v261_v43 }
 0x1cb   :  { %v247_v46 = vpop.xlane.xlu1 %246 }
 0x1cc   :  { %v277_v48 = vrot.slane %v247_v46, %v266_v45  ;;  %v243_v49 = vpop.xlane.xlu0 %242 }
 0x1cd   :  { %v267_v51 = vrot.slane %v243_v49, %v266_v45 }
 0x1ce   :  { %v278_v52 = vsel %vm268_vm0, %v277_v48, %v273_v47 }
 0x1cf   :  { %v269_v53 = vsel %vm268_vm0, %v267_v51, %v262_v50 }
 0x1d0   :  { %v280_v54 = vsel %vm279_vm1, %v278_v52, %v269_v53 }
 0x1d1   :  { %v282_v55 = vsel %vm254_vm2, %v280_v54, -inf }
 0x1d2   :  { %v284_v56 = vsel %vm283_vm3, %v282_v55, -inf }
 0x1d3   :  { %285 = vmax.xlane.f32.xlu0 %v284_v56 }
 0x260   :  { %v286_v57 = vpop.xlane.xlu0 %285 }
 0x261   :  { %v287_v58 = vsub.f32 %v282_v55, %v286_v57 }
 0x263   :  { %v288_v59 = vmul.f32 1.442695, %v287_v58 }
 0x265   :  { %379 = vpow2.f32 %v288_v59 }
 0x26f   :  { %v380_v60 = vpop.eup %379 }
 0x270   :  { %v290_v61 = vsel %vm283_vm3, %v380_v60, 0.0 }
 0x271   :  { %291 = vadd.xlane.f32.xlu1 %v290_v61 }
 0x2fe   :  { %v292_v62 = vpop.xlane.xlu1 %291 }
 0x2ff   :  { %381 = vrcp.f32 %v292_v62 }
 0x309   :  { %v382_v63 = vpop.eup %381 }
 0x30a   :  { %v294_v0 = vmul.f32 %v382_v63, %v380_v60 }
 0x30c   :  { %295 = vst.msk [vmem:[#allocation8] sm:$0x3] %vm283_vm3, %v294_v0 }
 0x30d   :  { %460 = shalt.err (!%p457_p0)
}
 0x30e   :  { %s461_s30 = scalar_lea.hbm %s573_s4, 32 }
 0x30f   :  { %p462_p1 = scmp.ne.s32.totalorder %s573_s4, %s461_s30  ;;  %p465_p2 = scmp.lt.u32.totalorder %s461_s30, %s573_s4 }
 0x311   :  { %p467_p3 = pnand %p465_p2, %p462_p1 }
 0x313   :  { %470 = shalt.err (!%p467_p3)
}
 0x314   :  { %305 = dma.vmem_to_hbm [thread:$0]  %s303_s26, 32, %s573_s4, [#allocation4]  }
 0x315   :  { %475 = dma.done.wait [#allocation4], 32  }
 0x316   :  { %476 = vsyncadd [#allocation4], 4294967264 }
 0x317   :  { %309 = vsyncpa [#allocation3], 1 }
 0x318   :  { %310 = vsyncpa [#allocation6], 1 }
 0x319   :  { %311 = vsyncpa [#allocation4], 1 }

</bundles_post_ra>
